<compile_context>
chip_gen: v5e
topology: v5e:2x2
jax: 0.10.0
libtpu: 0.0.40
codegen_flags: <defaults>
</compile_context>

<pallas_src>
import math
import numpy as np
import jax
import jax.numpy as jnp
from jax.experimental import pallas as pl
from jax.experimental.pallas import tpu as pltpu


# ---------------------------------------------------------------------------
# Pallas kernel: lane/sublane-dense elementwise add of the gathered agent
# encodings and the gathered scene-(0,0) features.
# ---------------------------------------------------------------------------
def _add_kernel(enc_ref, scn_ref, out_ref):
    # enc_ref / scn_ref / out_ref: (TB, LC) lane-dense VMEM tiles.
    out_ref[...] = enc_ref[...] + scn_ref[...]


# ---------------------------------------------------------------------------
# Host-side bookkeeping (replicates the PyTorch scene/agent loop exactly).
# ---------------------------------------------------------------------------
def _build_gather_indices(agent_masks, num_agents, n_agents):
    sel_agent_idx, sel_scene_idx = [], []
    scene_idx, agent_in_scene_idx = 0, 0
    for k in range(n_agents):
        if agent_masks[k]:
            sel_agent_idx.append(k)
            sel_scene_idx.append(scene_idx)
        agent_in_scene_idx += 1
        if scene_idx < len(num_agents) and agent_in_scene_idx >= num_agents[scene_idx]:
            scene_idx += 1
            agent_in_scene_idx = 0
    return sel_agent_idx, sel_scene_idx


def _cdiv(a, b):
    return -(-a // b)


_PALLAS_MIN_BYTES = 256 * 1024          # below this, fused XLA gather+add wins
_MAX_TB = 2048                          # folded rows per grid step
_VMEM_BUDGET = 12 * 1024 * 1024         # 3 arrays x 2 bufs footprint target
                                        # (< v5e's 16 MiB scoped default)


def _min_sublane(dtype):
    # Minimum sublane tile: 8 for 4-byte, 16 for 2-byte, 32 for 1-byte dtypes.
    return 8 * max(1, 4 // jnp.dtype(dtype).itemsize)


def _tiling(M, C, dtype):
    """Lane/sublane-dense tiling parameters for an [M, C] slab."""
    itemsize = jnp.dtype(dtype).itemsize
    sub = _min_sublane(dtype)
    # Fold F consecutive rows into one LC = lcm(C, 128) lane-dense row.
    F = 128 // math.gcd(C, 128)
    LC = F * C
    Mf = _cdiv(M, F)
    Mf_pad = max(sub, _cdiv(Mf, sub) * sub)      # sublane-dense, dtype-aware
    M_pad = Mf_pad * F                           # pad is < F*sub rows (tiny)
    # Rows per grid step, capped by the double-buffered VMEM footprint:
    #   (2 inputs + 1 output) x 2 pipeline buffers x TB x LC x itemsize.
    tb_budget = max(sub, (_VMEM_BUDGET // (6 * LC * itemsize)) // sub * sub)
    TB = min(_MAX_TB, Mf_pad, tb_budget)
    return F, LC, Mf_pad, M_pad, TB


def _pallas_add(enc_pad, scn_pad, *, LC, Mf_pad, TB, out_dtype):
    """enc_pad / scn_pad: [M_pad, C] pre-padded slabs (M_pad = Mf_pad * F)."""
    enc_f = enc_pad.reshape(Mf_pad, LC)          # free reshape (contiguous)
    scn_f = scn_pad.reshape(Mf_pad, LC)
    spec = pl.BlockSpec((TB, LC), lambda i: (i, 0))
    out_f = pl.pallas_call(
        _add_kernel,
        out_shape=jax.ShapeDtypeStruct((Mf_pad, LC), out_dtype),
        grid=(_cdiv(Mf_pad, TB),),               # ragged last block OK (Pallas clips)
        in_specs=[spec, spec],
        out_specs=spec,
        compiler_params=pltpu.CompilerParams(
            # Independent tiles; measured impact ~nil, but harmless and correct.
            dimension_semantics=("parallel",)),
    )(enc_f, scn_f)
    return out_f


# ---------------------------------------------------------------------------
# Forward pass.
# ---------------------------------------------------------------------------
def spatial_fetch_agent(fused_scene_nchw, agent_encodings, decode_coordinates,
                        agent_masks, num_agents, pretrain=False, use_pallas=None):
    """Pallas/JAX implementation of SpatialFetchAgent.forward.

    agent_masks / num_agents must be concrete host values (list / np.ndarray):
    exactly like the Python bookkeeping loop in the PyTorch module, they
    determine the *static* output shape. decode_coordinates is accepted but
    unused because transform_coordinates() hard-codes the fetch to [0, 0].
    """
    del decode_coordinates  # transform_coordinates() in the reference -> [0, 0]
    agent_masks = np.asarray(agent_masks, dtype=bool)
    num_agents = np.asarray(num_agents)
    N, C = agent_encodings.shape
    B, C2, _, _ = fused_scene_nchw.shape
    assert C == C2, "encoding_dim mismatch between scene channels and agent encodings"

    sel_agent_idx, sel_scene_idx = _build_gather_indices(agent_masks, num_agents, N)
    M = len(sel_agent_idx)
    if M == 0:
        return jnp.zeros((0, C), dtype=agent_encodings.dtype)

    if pretrain:
        # Pure gather: no arithmetic -> no Pallas round trip at all.
        agent_idx = jnp.asarray(sel_agent_idx, dtype=jnp.int32)
        return jnp.take(agent_encodings, agent_idx, axis=0)

    assert max(sel_scene_idx) < B, (
        "scene index exceeds batch size; check num_agents / agent_masks")

    # PyTorch type-promotion semantics (scene + encodings).
    out_dtype = jnp.result_type(agent_encodings.dtype, fused_scene_nchw.dtype)
    scene00 = fused_scene_nchw[:, :, 0, 0]                     # [B, C]; only pixel used

    if use_pallas is None:
        use_pallas = M * C * jnp.dtype(out_dtype).itemsize >= _PALLAS_MIN_BYTES

    if not use_pallas:
        # kB-scale slabs: fused XLA gather+add beats custom-call + grid overhead.
        agent_idx = jnp.asarray(sel_agent_idx, dtype=jnp.int32)
        scene_idx = jnp.asarray(sel_scene_idx, dtype=jnp.int32)
        enc_sel = jnp.take(agent_encodings, agent_idx, axis=0).astype(out_dtype)
        scn_sel = jnp.take(scene00, scene_idx, axis=0).astype(out_dtype)
        return enc_sel + scn_sel

    # -------- Pallas path: fold the padding into the gather indices ---------
    _, LC, Mf_pad, M_pad, TB = _tiling(M, C, out_dtype)
    agent_idx_np = np.zeros(M_pad, dtype=np.int32)
    scene_idx_np = np.zeros(M_pad, dtype=np.int32)
    agent_idx_np[:M] = sel_agent_idx
    scene_idx_np[:M] = sel_scene_idx

    enc_pad = jnp.take(agent_encodings, jnp.asarray(agent_idx_np), axis=0).astype(out_dtype)
    scn_pad = jnp.take(scene00, jnp.asarray(scene_idx_np), axis=0).astype(out_dtype)

    out_folded = _pallas_add(enc_pad, scn_pad,
                             LC=LC, Mf_pad=Mf_pad, TB=TB, out_dtype=out_dtype)
    return out_folded.reshape(M_pad, C)[:M]


if __name__ == "__main__":
    key = jax.random.PRNGKey(0)
    B, C, H, W = 2, 32, 16, 16                 # encoding_dim = 32
    num_agents = [3, 3]
    N = sum(num_agents)
    agent_masks = [True, False, True, True, True, False]
    M = int(np.sum(agent_masks))

    k1, k2, k3 = jax.random.split(key, 3)
    fused_scene = jax.random.normal(k1, (B, C, H, W), dtype=jnp.float32)
    agent_encodings = jax.random.normal(k2, (N, C), dtype=jnp.float32)
    decode_coordinates = jax.random.normal(k3, (M, 2), dtype=jnp.float32)  # unused

    # Plain NumPy reference replicating the PyTorch loop.
    ref_rows = []
    s_idx, ais = 0, 0
    fs_np = np.asarray(fused_scene)
    enc_np = np.asarray(agent_encodings)
    for k in range(N):
        if agent_masks[k]:
            ref_rows.append(enc_np[k] + fs_np[s_idx, :, 0, 0])
        ais += 1
        if ais >= num_agents[s_idx]:
            s_idx += 1
            ais = 0
    ref = np.stack(ref_rows, axis=0)

    # 1) Force the Pallas path so the kernel is exercised (the small example
    #    would otherwise take the fused-XLA fast path by the size gate).
    out = jax.block_until_ready(
        spatial_fetch_agent(fused_scene, agent_encodings, decode_coordinates,
                            agent_masks, num_agents, pretrain=False,
                            use_pallas=True))
    assert out.shape == (M, C)
    np.testing.assert_allclose(np.asarray(out), ref, rtol=1e-6, atol=1e-6)

    # 2) Auto-gated path (at this scale: fused XLA gather+add, no kernel).
    out_auto = jax.block_until_ready(
        spatial_fetch_agent(fused_scene, agent_encodings, decode_coordinates,
                            agent_masks, num_agents, pretrain=False))
    np.testing.assert_allclose(np.asarray(out_auto), ref, rtol=1e-6, atol=1e-6)

    # 3) Pretrain path: pure gather, no Pallas call at all.
    out_pre = jax.block_until_ready(
        spatial_fetch_agent(fused_scene, agent_encodings, decode_coordinates,
                            agent_masks, num_agents, pretrain=True))
    np.testing.assert_allclose(np.asarray(out_pre), enc_np[agent_masks],
                               rtol=1e-6, atol=1e-6)

    print("KERNEL_OK")
</pallas_src>

<mosaic_0001>
module attributes {stable_mosaic.version = 11 : i64} {
  func.func @_add_kernel(%arg0: i32, %arg1: memref<8x128xf32, #tpu.memory_space<vmem>>, %arg2: memref<8x128xf32, #tpu.memory_space<vmem>>, %arg3: memref<8x128xf32, #tpu.memory_space<vmem>>) attributes {dimension_semantics = [#tpu.dimension_semantics<parallel>], iteration_bounds = array<i64: 1>, scalar_prefetch = 0 : i64, scratch_operands = 0 : i64, tpu.core_type = #tpu.core_type<tc>, window_params = [{transform_indices = @transform_0, window_bounds = array<i64: 8, 128>}, {transform_indices = @transform_1, window_bounds = array<i64: 8, 128>}, {transform_indices = @transform_2, window_bounds = array<i64: 8, 128>}]} {
    %c0 = arith.constant 0 : index
    %c0_0 = arith.constant 0 : index
    %0 = vector.load %arg1[%c0, %c0_0] : memref<8x128xf32, #tpu.memory_space<vmem>>, vector<8x128xf32>
    %c0_1 = arith.constant 0 : index
    %c0_2 = arith.constant 0 : index
    %1 = vector.load %arg2[%c0_1, %c0_2] : memref<8x128xf32, #tpu.memory_space<vmem>>, vector<8x128xf32>
    %2 = arith.addf %0, %1 : vector<8x128xf32>
    %c0_3 = arith.constant 0 : index
    %c0_4 = arith.constant 0 : index
    %3 = vector.load %arg3[%c0_3, %c0_4] : memref<8x128xf32, #tpu.memory_space<vmem>>, vector<8x128xf32>
    tpu.vector_store %arg3[%c0_3, %c0_4], %2 {strides = array<i32>} : memref<8x128xf32, #tpu.memory_space<vmem>>, vector<8x128xf32>,
    return
  }
  func.func @transform_0(%arg0: i32) -> (i32, i32) {
    %c0_i32 = arith.constant 0 : i32
    %c0_i32_0 = arith.constant 0 : i32
    return %arg0, %c0_i32 : i32, i32
  }
  func.func @transform_1(%arg0: i32) -> (i32, i32) {
    %c0_i32 = arith.constant 0 : i32
    %c0_i32_0 = arith.constant 0 : i32
    return %arg0, %c0_i32 : i32, i32
  }
  func.func @transform_2(%arg0: i32) -> (i32, i32) {
    %c0_i32 = arith.constant 0 : i32
    %c0_i32_0 = arith.constant 0 : i32
    return %arg0, %c0_i32 : i32, i32
  }
}

</mosaic_0001>

<bundles_post_ra>
// kernel: tpu_custom_call.1
= control target key start
LH: loop header
LB: loop body
LE: loop exit
PB: predicated region body
PF: predicated region fallthrough
CT: control target
= control target key end

     0   :  { %7 = vsyncpa [#allocation3], 0  ;;  %s170_s0 = inlined_call_operand.hbm [shape: f32[8,128], index: 0, kind: input, shape index: {}]   ;;  %s171_s1 = inlined_call_operand.hbm [shape: f32[8,128], index: 1, kind: input, shape index: {}]   ;;  %s172_s2 = inlined_call_operand.hbm [shape: f32[8,128], index: 2, kind: output, shape index: {}]  }
   0x1   :  { %8 = vsyncpa [#allocation6], 0 }
   0x2   :  { %9 = vsyncpa [#allocation4], 0  ;;  %s15_s11 = sshll.u32 %s170_s0, 4  ;;  %s143_s12 = smov [#allocation2]   ;;  %s16_s11 = int_to_ptr.hbm [resolvable:$true] %s15_s11 }
   0x3   :  { %s17_s13 = sshll.u32 %s143_s12, 4  ;;  %s26_s16 = sshll.u32 %s171_s1, 4  ;;  %s18_s13 = int_to_ptr.vmem [resolvable:$true] %s17_s13  ;;  %s27_s16 = int_to_ptr.hbm [resolvable:$true] %s26_s16 }
   0x4   :  { %20 = dma.hbm_to_vmem [thread:$0]  %s16_s11, 128, %s18_s13, [#allocation3]  }
   0x5   :  { %s144_s17 = smov [#allocation5]  }
   0x6   :  { %s28_s18 = sshll.u32 %s144_s17, 4  ;;  %s29_s18 = int_to_ptr.vmem [resolvable:$true] %s28_s18 }
   0x7   :  { %31 = dma.hbm_to_vmem [thread:$0]  %s27_s16, 128, %s29_s18, [#allocation6]  }
   0x8   :  { %137 = dma.done.wait [#allocation3], 128  }
   0x9   :  { %138 = vsyncadd [#allocation3], 4294967168 }
   0xa   :  { %139 = dma.done.wait [#allocation6], 128  }
   0xb   :  { %140 = vsyncadd [#allocation6], 4294967168  ;;  %s145_s19 = smov [#allocation7]   ;;  %s51_s22 = sshll.u32 %s172_s2, 4  ;;  %v40_v0 = vld [vmem:[#allocation2] sm:$0xff]  ;;  %v41_v1 = vld [vmem:[#allocation5] sm:$0xff]  ;;  %s52_s22 = int_to_ptr.hbm [resolvable:$true] %s51_s22 }
   0xc   :  { %s49_s0 = sshll.u32 %s145_s19, 4  ;;  %v42_v2 = vadd.f32 %v41_v1, %v40_v0  ;;  %s50_s0 = int_to_ptr.vmem [resolvable:$true] %s49_s0 }
   0xe   :  { %43 = vst [vmem:[#allocation7] sm:$0xff] %v42_v2 }
   0xf   :  { %54 = dma.vmem_to_hbm [thread:$0]  %s50_s0, 128, %s52_s22, [#allocation4]  }
  0x10   :  { %141 = dma.done.wait [#allocation4], 128  }
  0x11   :  { %142 = vsyncadd [#allocation4], 4294967168 }
  0x12   :  { %59 = vsyncpa [#allocation3], 1 }
  0x13   :  { %60 = vsyncpa [#allocation6], 1 }
  0x14   :  { %61 = vsyncpa [#allocation4], 1 }

</bundles_post_ra>
